<compile_context>
chip_gen: v7x
topology: tpu7x:2x2x1
jax: 0.10.0
libtpu: 0.0.40
codegen_flags: <defaults>
</compile_context>

<pallas_src>
import functools

import jax
import jax.numpy as jnp
from jax.experimental import pallas as pl
from jax.experimental.pallas import tpu as pltpu

LANE = 128
SUBLANE = 8


def _round_up(n, m):
    return ((n + m - 1) // m) * m


def _pad_to(a, shape):
    return jnp.pad(a, [(0, s - d) for d, s in zip(a.shape, shape)])


def _vae_kernel(x_ref, w_enc_ref, b_enc_ref, w_dec_ref, b_dec_ref, rand_ref,
                out_ref, *, out_p):
    # --- fused mu|sigma projection: single MXU pass (bf16 in, f32 accumulate) ---
    enc = jnp.dot(x_ref[...], w_enc_ref[...], preferred_element_type=jnp.float32)
    enc = jnp.tanh(enc + b_enc_ref[...])          # one batched tanh over the slab

    mu = enc[:, :out_p]                           # static, 128-aligned slices
    sigma = jnp.exp(enc[:, out_p:])

    # --- reparameterization: encoded = rand * sigma + mu (f32 on the VPU) ------
    encoded = rand_ref[...] * sigma + mu

    # --- decoder: tanh(encoded @ W_dec + b_dec) --------------------------------
    dec = jnp.dot(encoded.astype(w_dec_ref.dtype), w_dec_ref[...],
                  preferred_element_type=jnp.float32)
    out_ref[...] = jnp.tanh(dec + b_dec_ref[...])


def internal_v_autoencoder(x, w_mu, b_mu, w_sig, b_sig, w_dec, b_dec, rand,
                           *, batch_tile=512):
    """x:[B,in], W stored as [fan_in, fan_out] (pre-transposed vs torch), b:[1,out]."""
    B, in_features = x.shape
    out_features = w_mu.shape[1]

    # Lane-dense padding of every feature dim; batch tiled into grid steps.
    in_p = _round_up(in_features, LANE)
    out_p = _round_up(out_features, LANE)
    bt = min(batch_tile, _round_up(B, SUBLANE))
    b_p = _round_up(B, bt)

    # Streamed tensors: x in bf16 (MXU operand), rand stays f32.
    x_pad = _pad_to(x, (b_p, in_p)).astype(jnp.bfloat16)
    rand_pad = _pad_to(rand.astype(jnp.float32), (b_p, out_p))

    # Fused encoder weight/bias: columns [0:out_p) = mu half, [out_p:2*out_p) = sigma half.
    w_enc = jnp.zeros((in_p, 2 * out_p), jnp.bfloat16)
    w_enc = w_enc.at[:in_features, :out_features].set(w_mu.astype(jnp.bfloat16))
    w_enc = w_enc.at[:in_features, out_p:out_p + out_features].set(
        w_sig.astype(jnp.bfloat16))
    b_enc = jnp.zeros((1, 2 * out_p), jnp.float32)
    b_enc = b_enc.at[:, :out_features].set(b_mu.astype(jnp.float32))
    b_enc = b_enc.at[:, out_p:out_p + out_features].set(b_sig.astype(jnp.float32))

    w_dec_pad = _pad_to(w_dec.astype(jnp.bfloat16), (out_p, in_p))
    b_dec_pad = _pad_to(b_dec.astype(jnp.float32), (1, in_p))

    kernel = functools.partial(_vae_kernel, out_p=out_p)

    decoded_pad = pl.pallas_call(
        kernel,
        out_shape=jax.ShapeDtypeStruct((b_p, in_p), jnp.float32),
        grid=(b_p // bt,),
        in_specs=[
            pl.BlockSpec((bt, in_p), lambda i: (i, 0)),          # x        (streamed)
            pl.BlockSpec((in_p, 2 * out_p), lambda i: (0, 0)),   # W_mu|sig (resident)
            pl.BlockSpec((1, 2 * out_p), lambda i: (0, 0)),      # b_mu|sig (resident)
            pl.BlockSpec((out_p, in_p), lambda i: (0, 0)),       # W_dec    (resident)
            pl.BlockSpec((1, in_p), lambda i: (0, 0)),           # b_dec    (resident)
            pl.BlockSpec((bt, out_p), lambda i: (i, 0)),         # rand     (streamed)
        ],
        out_specs=pl.BlockSpec((bt, in_p), lambda i: (i, 0)),
        compiler_params=pltpu.CompilerParams(
            dimension_semantics=("parallel",)),                  # megacore on v7x
    )(x_pad, w_enc, b_enc, w_dec_pad, b_dec_pad, rand_pad)

    return decoded_pad[:B, :in_features]


def _init_linear(key, fan_in, fan_out):
    # Deterministic PyTorch-like init: U(-1/sqrt(fan_in), 1/sqrt(fan_in)).
    kw, kb = jax.random.split(key)
    bound = 1.0 / jnp.sqrt(fan_in)
    # Stored as [fan_in, fan_out] so the kernel does x @ W (= x @ W_torch.T).
    w = jax.random.uniform(kw, (fan_in, fan_out), jnp.float32, -bound, bound)
    b = jax.random.uniform(kb, (1, fan_out), jnp.float32, -bound, bound)
    return w, b


if __name__ == "__main__":
    key = jax.random.PRNGKey(0)
    k_x, k_mu, k_sig, k_dec, k_rand = jax.random.split(key, 5)

    B, in_features, out_features = 8, 32, 16

    x = jax.random.normal(k_x, (B, in_features), jnp.float32)
    w_mu, b_mu = _init_linear(k_mu, in_features, out_features)
    w_sig, b_sig = _init_linear(k_sig, in_features, out_features)
    w_dec, b_dec = _init_linear(k_dec, out_features, in_features)
    rand = jax.random.normal(k_rand, (B, out_features), jnp.float32)

    decoded = internal_v_autoencoder(x, w_mu, b_mu, w_sig, b_sig,
                                     w_dec, b_dec, rand)
    jax.block_until_ready(decoded)

    # Reference with matching bf16 MXU operands / f32 accumulation (tight check).
    bf = jnp.bfloat16
    xb = x.astype(bf)
    mu_ref = jnp.tanh(
        jnp.dot(xb, w_mu.astype(bf), preferred_element_type=jnp.float32) + b_mu)
    sig_ref = jnp.exp(jnp.tanh(
        jnp.dot(xb, w_sig.astype(bf), preferred_element_type=jnp.float32) + b_sig))
    enc_ref = rand * sig_ref + mu_ref
    dec_ref = jnp.tanh(
        jnp.dot(enc_ref.astype(bf), w_dec.astype(bf),
                preferred_element_type=jnp.float32) + b_dec)
    assert jnp.allclose(decoded, dec_ref, atol=2e-3, rtol=2e-3), \
        "mismatch vs bf16-matmul reference"

    # Loose check against the pure-f32 module semantics (bf16 MXU rounding only).
    mu_f = jnp.tanh(x @ w_mu + b_mu)
    sig_f = jnp.exp(jnp.tanh(x @ w_sig + b_sig))
    dec_f = jnp.tanh((rand * sig_f + mu_f) @ w_dec + b_dec)
    assert jnp.allclose(decoded, dec_f, atol=7e-2, rtol=7e-2), \
        "mismatch vs f32 reference"

    print("KERNEL_OK")
</pallas_src>

<mosaic_0001>
module attributes {stable_mosaic.version = 11 : i64} {
  func.func @_vae_kernel(%arg0: i32, %arg1: memref<8x128xbf16, #tpu.memory_space<vmem>>, %arg2: memref<128x256xbf16, #tpu.memory_space<vmem>>, %arg3: memref<1x256xf32, #tpu.memory_space<vmem>>, %arg4: memref<128x128xbf16, #tpu.memory_space<vmem>>, %arg5: memref<1x128xf32, #tpu.memory_space<vmem>>, %arg6: memref<8x128xf32, #tpu.memory_space<vmem>>, %arg7: memref<8x128xf32, #tpu.memory_space<vmem>>) attributes {dimension_semantics = [#tpu.dimension_semantics<parallel>], iteration_bounds = array<i64: 1>, scalar_prefetch = 0 : i64, scratch_operands = 0 : i64, tpu.core_type = #tpu.core_type<tc>, window_params = [{transform_indices = @transform_0, window_bounds = array<i64: 8, 128>}, {pipeline_mode = #tpu.pipeline_mode<synchronous>, transform_indices = @transform_1, window_bounds = array<i64: 128, 256>}, {pipeline_mode = #tpu.pipeline_mode<synchronous>, transform_indices = @transform_2, window_bounds = array<i64: 1, 256>}, {pipeline_mode = #tpu.pipeline_mode<synchronous>, transform_indices = @transform_3, window_bounds = array<i64: 128, 128>}, {pipeline_mode = #tpu.pipeline_mode<synchronous>, transform_indices = @transform_4, window_bounds = array<i64: 1, 128>}, {transform_indices = @transform_5, window_bounds = array<i64: 8, 128>}, {transform_indices = @transform_6, window_bounds = array<i64: 8, 128>}]} {
    %c0 = arith.constant 0 : index
    %c0_0 = arith.constant 0 : index
    %0 = vector.load %arg1[%c0, %c0_0] : memref<8x128xbf16, #tpu.memory_space<vmem>>, vector<8x128xbf16>
    %c0_1 = arith.constant 0 : index
    %c0_2 = arith.constant 0 : index
    %1 = vector.load %arg2[%c0_1, %c0_2] : memref<128x256xbf16, #tpu.memory_space<vmem>>, vector<128x256xbf16>
    %cst = arith.constant dense<0.000000e+00> : vector<8x256xf32>
    %2 = tpu.matmul %0, %1, %cst {dimension_numbers = #tpu.dot_dimension_numbers<[1], [0], [0], [1], [0, 0, 1, 1], [], []>} : vector<8x128xbf16>, vector<128x256xbf16>, vector<8x256xf32> -> vector<8x256xf32>
    %c0_3 = arith.constant 0 : index
    %c0_4 = arith.constant 0 : index
    %3 = vector.load %arg3[%c0_3, %c0_4] : memref<1x256xf32, #tpu.memory_space<vmem>>, vector<1x256xf32>
    %4 = vector.broadcast %3 : vector<1x256xf32> to vector<8x256xf32>
    %5 = arith.addf %2, %4 : vector<8x256xf32>
    %6 = math.tanh %5 : vector<8x256xf32>
    %7 = vector.extract_strided_slice %6 {offsets = [0, 0], sizes = [8, 128], strides = [1, 1]} : vector<8x256xf32> to vector<8x128xf32>
    %8 = vector.extract_strided_slice %6 {offsets = [0, 128], sizes = [8, 128], strides = [1, 1]} : vector<8x256xf32> to vector<8x128xf32>
    %9 = math.exp %8 : vector<8x128xf32>
    %c0_5 = arith.constant 0 : index
    %c0_6 = arith.constant 0 : index
    %10 = vector.load %arg6[%c0_5, %c0_6] : memref<8x128xf32, #tpu.memory_space<vmem>>, vector<8x128xf32>
    %11 = arith.mulf %10, %9 : vector<8x128xf32>
    %12 = arith.addf %11, %7 : vector<8x128xf32>
    %13 = arith.truncf %12 : vector<8x128xf32> to vector<8x128xbf16>
    %c0_7 = arith.constant 0 : index
    %c0_8 = arith.constant 0 : index
    %14 = vector.load %arg4[%c0_7, %c0_8] : memref<128x128xbf16, #tpu.memory_space<vmem>>, vector<128x128xbf16>
    %cst_9 = arith.constant dense<0.000000e+00> : vector<8x128xf32>
    %15 = tpu.matmul %13, %14, %cst_9 {dimension_numbers = #tpu.dot_dimension_numbers<[1], [0], [0], [1], [0, 0, 1, 1], [], []>} : vector<8x128xbf16>, vector<128x128xbf16>, vector<8x128xf32> -> vector<8x128xf32>
    %c0_10 = arith.constant 0 : index
    %c0_11 = arith.constant 0 : index
    %16 = vector.load %arg5[%c0_10, %c0_11] : memref<1x128xf32, #tpu.memory_space<vmem>>, vector<1x128xf32>
    %17 = vector.broadcast %16 : vector<1x128xf32> to vector<8x128xf32>
    %18 = arith.addf %15, %17 : vector<8x128xf32>
    %19 = math.tanh %18 : vector<8x128xf32>
    %c0_12 = arith.constant 0 : index
    %c0_13 = arith.constant 0 : index
    %20 = vector.load %arg7[%c0_12, %c0_13] : memref<8x128xf32, #tpu.memory_space<vmem>>, vector<8x128xf32>
    tpu.vector_store %arg7[%c0_12, %c0_13], %19 {strides = array<i32>} : memref<8x128xf32, #tpu.memory_space<vmem>>, vector<8x128xf32>,
    return
  }
  func.func @transform_0(%arg0: i32) -> (i32, i32) {
    %c0_i32 = arith.constant 0 : i32
    %c0_i32_0 = arith.constant 0 : i32
    return %arg0, %c0_i32 : i32, i32
  }
  func.func @transform_1(%arg0: i32) -> (i32, i32) {
    %c0_i32 = arith.constant 0 : i32
    %c0_i32_0 = arith.constant 0 : i32
    %c0_i32_1 = arith.constant 0 : i32
    return %c0_i32, %c0_i32_0 : i32, i32
  }
  func.func @transform_2(%arg0: i32) -> (i32, i32) {
    %c0_i32 = arith.constant 0 : i32
    %c0_i32_0 = arith.constant 0 : i32
    %c0_i32_1 = arith.constant 0 : i32
    return %c0_i32, %c0_i32_0 : i32, i32
  }
  func.func @transform_3(%arg0: i32) -> (i32, i32) {
    %c0_i32 = arith.constant 0 : i32
    %c0_i32_0 = arith.constant 0 : i32
    %c0_i32_1 = arith.constant 0 : i32
    return %c0_i32, %c0_i32_0 : i32, i32
  }
  func.func @transform_4(%arg0: i32) -> (i32, i32) {
    %c0_i32 = arith.constant 0 : i32
    %c0_i32_0 = arith.constant 0 : i32
    %c0_i32_1 = arith.constant 0 : i32
    return %c0_i32, %c0_i32_0 : i32, i32
  }
  func.func @transform_5(%arg0: i32) -> (i32, i32) {
    %c0_i32 = arith.constant 0 : i32
    %c0_i32_0 = arith.constant 0 : i32
    return %arg0, %c0_i32 : i32, i32
  }
  func.func @transform_6(%arg0: i32) -> (i32, i32) {
    %c0_i32 = arith.constant 0 : i32
    %c0_i32_0 = arith.constant 0 : i32
    return %arg0, %c0_i32 : i32, i32
  }
}

</mosaic_0001>

<bundles_post_ra>
// kernel: tpu_custom_call.1
= control target key start
LH: loop header
LB: loop body
LE: loop exit
PB: predicated region body
PF: predicated region fallthrough
CT: control target
= control target key end

     0   :  { %11 = vsyncpa [#allocation3], 0  ;;  %s653_s0 = inlined_call_operand.hbm [shape: bf16[8,128], index: 0, kind: input, shape index: {}]   ;;  %s654_s1 = inlined_call_operand.hbm [shape: bf16[128,256], index: 1, kind: input, shape index: {}]   ;;  %s655_s2 = inlined_call_operand.vmem [shape: f32[1,256], index: 2, kind: input, shape index: {}]   ;;  %s656_s3 = inlined_call_operand.hbm [shape: bf16[128,128], index: 3, kind: input, shape index: {}]   ;;  %s657_s4 = inlined_call_operand.vmem [shape: f32[1,128], index: 4, kind: input, shape index: {}]   ;;  %s658_s5 = inlined_call_operand.vmem [shape: f32[8,128], index: 5, kind: input, shape index: {}]   ;;  %s659_s6 = inlined_call_operand.hbm [shape: f32[8,128], index: 6, kind: output, shape index: {}]  }
   0x1   :  { %12 = vsyncpa [#allocation6], 0 }
   0x2   :  { %13 = vsyncpa [#allocation4], 0  ;;  %s550_s21 = smov [#allocation5]   ;;  %s456_s25 = scalar_lea.hbm %s654_s1, 2048 }
   0x3   :  { %s29_s22 = sshll.u32 %s550_s21, 4  ;;  %p457_p0 = scmp.ne.s32.totalorder %s654_s1, %s456_s25  ;;  %s30_s22 = int_to_ptr.vmem [resolvable:$true] %s29_s22 }
   0x4   :  { %p460_p1 = scmp.lt.u32.totalorder %s456_s25, %s654_s1 }
   0x6   :  { %p462_p2 = pnand %p460_p1, %p457_p0 }
   0x8   :  { %465 = shalt.err (!%p462_p2)
}
   0x9   :  { %s466_s30 = scalar_lea.vmem %s30_s22, 2048  ;;  %p471_p4 = scmp.lt.s32.totalorder %s30_s22, %s30_s22 }
   0xa   :  { %p467_p3 = scmp.ne.s32.totalorder %s30_s22, %s466_s30  ;;  %p472_p5 = scmp.lt.s32.totalorder %s466_s30, %s466_s30 }
   0xc   :  { %p473_p6 = por %p472_p5, %p471_p4 }
   0xe   :  { %p474_p7 = pnand %p473_p6, %p467_p3 }
  0x10   :  { %477 = shalt.err (!%p474_p7)
}
  0x11   :  { %s551_s7 = smov 128   ;;  %s552_s8 = smov 8  }
  0x12   :  { %35 = dma.hbm_to_vmem [thread:$0]  %s654_s1, 2048, %s30_s22, [#allocation6], %s551_s7, %s551_s7, %s552_s8  }
  0x13   :  { %s553_s11 = smov [#allocation2]   ;;  %s554_s13 = smov [#allocation7]  }
  0x14   :  { %s20_s12 = sshll.u32 %s553_s11, 4  ;;  %s43_s14 = sshll.u32 %s554_s13, 4  ;;  %s21_s12 = int_to_ptr.vmem [resolvable:$true] %s20_s12  ;;  %s44_s14 = int_to_ptr.vmem [resolvable:$true] %s43_s14 }
  0x15   :  { %s478_s17 = scalar_lea.hbm %s653_s0, 64 }
  0x16   :  { %p479_p8 = scmp.ne.s32.totalorder %s653_s0, %s478_s17  ;;  %p482_p9 = scmp.lt.u32.totalorder %s478_s17, %s653_s0 }
  0x18   :  { %p484_p10 = pnand %p482_p9, %p479_p8 }
  0x1a   :  { %487 = shalt.err (!%p484_p10)
}
  0x1b   :  { %s488_s1 = scalar_lea.vmem %s21_s12, 64  ;;  %p493_p12 = scmp.lt.s32.totalorder %s21_s12, %s21_s12 }
  0x1c   :  { %p489_p11 = scmp.ne.s32.totalorder %s21_s12, %s488_s1  ;;  %p494_p13 = scmp.lt.s32.totalorder %s488_s1, %s488_s1 }
  0x1e   :  { %p495_p0 = por %p494_p13, %p493_p12 }
  0x20   :  { %p496_p1 = pnand %p495_p0, %p489_p11 }
  0x22   :  { %499 = shalt.err (!%p496_p1)
}
  0x23   :  { %23 = dma.hbm_to_vmem [thread:$0]  %s653_s0, 64, %s21_s12, [#allocation3]  }
  0x24   :  { %s500_s26 = scalar_lea.hbm %s656_s3, 1024 }
  0x25   :  { %p501_p2 = scmp.ne.s32.totalorder %s656_s3, %s500_s26  ;;  %p504_p3 = scmp.lt.u32.totalorder %s500_s26, %s656_s3 }
  0x27   :  { %p506_p4 = pnand %p504_p3, %p501_p2 }
  0x29   :  { %509 = shalt.err (!%p506_p4)
}
  0x2a   :  { %s510_s7 = scalar_lea.vmem %s44_s14, 1024  ;;  %p515_p6 = scmp.lt.s32.totalorder %s44_s14, %s44_s14 }
  0x2b   :  { %p511_p5 = scmp.ne.s32.totalorder %s44_s14, %s510_s7  ;;  %p516_p7 = scmp.lt.s32.totalorder %s510_s7, %s510_s7 }
  0x2d   :  { %p517_p8 = por %p516_p7, %p515_p6 }
  0x2f   :  { %p518_p9 = pnand %p517_p8, %p511_p5 }
  0x31   :  { %521 = shalt.err (!%p518_p9)
}
  0x32   :  { %s555_s0 = smov 64   ;;  %s556_s8 = smov 4  }
  0x33   :  { %49 = dma.hbm_to_vmem [thread:$0]  %s656_s3, 1024, %s44_s14, [#allocation6], %s555_s0, %s555_s0, %s556_s8  }
  0x34   :  { %544 = dma.done.wait [#allocation3], 64  }
  0x35   :  { %545 = vsyncadd [#allocation3], 4294967232 }
  0x36   :  { %546 = dma.done.wait [#allocation6], 3072  }
  0x37   :  { %547 = vsyncadd [#allocation6], 4294964224  ;;  %v557_v0 = vmov 0   ;;  %v416_v1 = vld [vmem:[#allocation5 + $0x4] ss:$8 sps:$4 sm:$0xff]   ;;  %v558_v19 = vmov 0.0   ;;  %v83_v27 = vlaneseq }
  0x38   :  { %205 = vmatprep.mubr.bf16.mxu0 %v557_v0  ;;  %v418_v2 = vld [vmem:[#allocation5] ss:$8 sps:$4 sm:$0xff]   ;;  %173 = vmatprep.subr.bf16.mxu0 %v416_v1  ;;  %v419_v3 = vld [vmem:[#allocation5 + $0x14] ss:$8 sps:$4 sm:$0xff]   ;;  %v421_v4 = vld [vmem:[#allocation5 + $0x10] ss:$8 sps:$4 sm:$0xff]  }
  0x39   :  { %174 = vmatpush1.bf16.msra.mxu0 %v418_v2  ;;  %v422_v5 = vld [vmem:[#allocation5 + $0x24] ss:$8 sps:$4 sm:$0xff]   ;;  %v424_v6 = vld [vmem:[#allocation5 + $0x20] ss:$8 sps:$4 sm:$0xff]   ;;  %v425_v7 = vld [vmem:[#allocation5 + $0x34] ss:$8 sps:$4 sm:$0xff]   ;;  %385 = vmatprep.subr.bf16.mxu1 %v558_v19 }
  0x3a   :  { %175 = vmatprep.subr.bf16.mxu0 %v419_v3  ;;  %v427_v8 = vld [vmem:[#allocation5 + $0x30] ss:$8 sps:$4 sm:$0xff]   ;;  %v428_v9 = vld [vmem:[#allocation5 + $0x44] ss:$8 sps:$4 sm:$0xff]   ;;  %v430_v10 = vld [vmem:[#allocation5 + $0x40] ss:$8 sps:$4 sm:$0xff]  }
  0x3b   :  { %v431_v11 = vld [vmem:[#allocation5 + $0x54] ss:$8 sps:$4 sm:$0xff]   ;;  %v433_v12 = vld [vmem:[#allocation5 + $0x50] ss:$8 sps:$4 sm:$0xff]   ;;  %v434_v13 = vld [vmem:[#allocation5 + $0x64] ss:$8 sps:$4 sm:$0xff]  }
  0x3c   :  { %v436_v14 = vld [vmem:[#allocation5 + $0x60] ss:$8 sps:$4 sm:$0xff]   ;;  %v437_v15 = vld [vmem:[#allocation5 + $0x74] ss:$8 sps:$4 sm:$0xff]   ;;  %v439_v16 = vld [vmem:[#allocation5 + $0x70] ss:$8 sps:$4 sm:$0xff]  }
  0x3d   :  { %176 = vmatpush1.bf16.msra.mxu0 %v421_v4  ;;  %v64_v17 = vld [vmem:[#allocation2] sm:$0xf]  ;;  %v440_v18 = vld [vmem:[#allocation7] sm:$0xff]   ;;  %v441_v20 = vld [vmem:[#allocation7 + $0x8] sm:$0xff]   ;;  %vm559_vm0 = vmmov 0   ;;  %v84_v28 = vshrl.u32 %v83_v27, 7 }
  0x3e   :  { %177 = vmatprep.subr.bf16.mxu0 %v422_v5  ;;  %386 = vmatpush3.bf16.msra.mxu1 %v440_v18  ;;  %v442_v21 = vld [vmem:[#allocation7 + $0x10] sm:$0xff]   ;;  %v443_v22 = vld [vmem:[#allocation7 + $0x18] sm:$0xff]   ;;  %v444_v23 = vld [vmem:[#allocation7 + $0x20] sm:$0xff]   ;;  %s560_s15 = smov [#allocation8]  }
  0x3f   :  { %387 = vmatprep.subr.bf16.mxu1 %v558_v19  ;;  %401 = vmatprep.mubr.msk.bf16.mxu1 %vm559_vm0, %v558_v19  ;;  %v445_v24 = vld [vmem:[#allocation7 + $0x28] sm:$0xff]   ;;  %v446_v25 = vld [vmem:[#allocation7 + $0x30] sm:$0xff]   ;;  %v447_v26 = vld [vmem:[#allocation7 + $0x38] sm:$0xff]   ;;  %v89_v29 = vsub.s32 1, %v84_v28  ;;  %v85_v37 = vsub.s32 0, %v84_v28  ;;  %s341_s16 = sshll.u32 %s560_s15, 4  ;;  %s342_s16 = int_to_ptr.vmem [resolvable:$true] %s341_s16 }
  0x40   :  { %v81_v30 = vld [vmem:[%s655_s2] sm:$0x3]  ;;  %p527_p11 = scmp.lt.s32.totalorder %s342_s16, %s342_s16 }
  0x41   :  { %178 = vmatpush1.bf16.msra.mxu0 %v424_v6  ;;  %v90_v31 = vrot.slane %v81_v30, %v89_v29  ;;  %v86_v38 = vrot.slane %v81_v30, %v85_v37  ;;  %v218_v42 = vld [vmem:[%s658_s5] sm:$0xff]  ;;  %s522_s5 = scalar_lea.vmem %s342_s16, 128 }
  0x42   :  { %179 = vmatprep.subr.bf16.mxu0 %v425_v7  ;;  %388 = vmatpush3.bf16.msra.mxu1 %v441_v20  ;;  %v367_v48 = vld [vmem:[%s657_s4] ss:$0 sm:$0xff]  ;;  %p523_p10 = scmp.ne.s32.totalorder %s342_s16, %s522_s5  ;;  %p528_p12 = scmp.lt.s32.totalorder %s522_s5, %s522_s5 }
  0x43   :  { %389 = vmatprep.subr.bf16.mxu1 %v558_v19 }
  0x44   :  { %p529_p13 = por %p528_p12, %p527_p11 }
  0x45   :  { %180 = vmatpush1.bf16.msra.mxu0 %v427_v8 }
  0x46   :  { %181 = vmatprep.subr.bf16.mxu0 %v428_v9  ;;  %390 = vmatpush3.bf16.msra.mxu1 %v442_v21  ;;  %p530_p0 = pnand %p529_p13, %p523_p10 }
  0x47   :  { %391 = vmatprep.subr.bf16.mxu1 %v558_v19 }
  0x49   :  { %182 = vmatpush1.bf16.msra.mxu0 %v430_v10 }
  0x4a   :  { %183 = vmatprep.subr.bf16.mxu0 %v431_v11  ;;  %392 = vmatpush3.bf16.msra.mxu1 %v443_v22 }
  0x4b   :  { %393 = vmatprep.subr.bf16.mxu1 %v558_v19 }
  0x4d   :  { %184 = vmatpush1.bf16.msra.mxu0 %v433_v12 }
  0x4e   :  { %185 = vmatprep.subr.bf16.mxu0 %v434_v13  ;;  %394 = vmatpush3.bf16.msra.mxu1 %v444_v23 }
  0x4f   :  { %395 = vmatprep.subr.bf16.mxu1 %v558_v19 }
  0x51   :  { %186 = vmatpush1.bf16.msra.mxu0 %v436_v14 }
  0x52   :  { %187 = vmatprep.subr.bf16.mxu0 %v437_v15  ;;  %396 = vmatpush3.bf16.msra.mxu1 %v445_v24 }
  0x53   :  { %397 = vmatprep.subr.bf16.mxu1 %v558_v19 }
  0x55   :  { %188 = vmatpush1.bf16.msra.mxu0 %v439_v16 }
  0x56   :  { %398 = vmatpush3.bf16.msra.mxu1 %v446_v25 }
  0x57   :  { %399 = vmatprep.subr.bf16.mxu1 %v558_v19 }
  0x58   :  { %206 = vmatmul.mubr.bf16.vlgmr.msra.gmra.mrb[0].mxu0 %v64_v17 }
  0x5a   :  { %400 = vmatpush3.bf16.msra.mxu1 %v447_v26 }
 0x12b   :  { %v207_v32 = vpop.f32.mrb[0].mxu0 }
 0x12c   :  { %v209_v33 = vpop.f32.mrb[1].mxu0  ;;  %v208_v40 = vadd.f32 %v207_v32, %v86_v38 }
 0x12d   :  { %v210_v34 = vadd.f32 %v209_v33, %v90_v31  ;;  %v211_v35 = vpop.f32.mrb[2].mxu0 }
 0x12e   :  { %v212_v36 = vpop.f32.mrb[3].mxu0 }
 0x12f   :  { %448 = vtanh.f32 %v210_v34 }
 0x139   :  { %v449_v39 = vpop.eup %448 }
 0x13a   :  { %v216_v41 = vmul.f32 1.442695, %v449_v39 }
 0x13c   :  { %450 = vpow2.f32 %v216_v41 }
 0x13d   :  { %452 = vtanh.f32 %v208_v40 }
 0x146   :  { %v451_v43 = vpop.eup %450 }
 0x147   :  { %v219_v44 = vmul.f32 %v451_v43, %v218_v42  ;;  %v453_v45 = vpop.eup %452 }
 0x149   :  { %v220_v46 = vadd.f32 %v453_v45, %v219_v44 }
 0x14b   :  { %v221_v47 = vpack.c.bf16 %v220_v46, %v220_v46 }
 0x14d   :  { %402 = vmatmul.mubr.bf16.vlgmr.msra.gmra.mrb[0].mxu1 %v221_v47 }
 0x220   :  { %v327_v49 = vpop.f32.mrb[0].mxu1 }
 0x221   :  { %v328_v50 = vadd.f32 %v367_v48, %v327_v49  ;;  %v403_v51 = vpop.f32.mrb[1].mxu1 }
 0x222   :  { %v330_v52 = vpop.f32.mrb[2].mxu1 }
 0x223   :  { %454 = vtanh.f32 %v328_v50  ;;  %v404_v53 = vpop.f32.mrb[3].mxu1 }
 0x22d   :  { %v455_v54 = vpop.eup %454 }
 0x22e   :  { %334 = vst [vmem:[#allocation8] sm:$0xff] %v455_v54 }
 0x22f   :  { %533 = shalt.err (!%p530_p0)
}
 0x230   :  { %s534_s18 = scalar_lea.hbm %s659_s6, 128 }
 0x231   :  { %p535_p1 = scmp.ne.s32.totalorder %s659_s6, %s534_s18  ;;  %p538_p2 = scmp.lt.u32.totalorder %s534_s18, %s659_s6 }
 0x233   :  { %p540_p3 = pnand %p538_p2, %p535_p1 }
 0x235   :  { %543 = shalt.err (!%p540_p3)
}
 0x236   :  { %344 = dma.vmem_to_hbm [thread:$0]  %s342_s16, 128, %s659_s6, [#allocation4]  }
 0x237   :  { %548 = dma.done.wait [#allocation4], 128  }
 0x238   :  { %549 = vsyncadd [#allocation4], 4294967168 }
 0x239   :  { %348 = vsyncpa [#allocation3], 1 }
 0x23a   :  { %349 = vsyncpa [#allocation6], 1 }
 0x23b   :  { %350 = vsyncpa [#allocation4], 1 }

</bundles_post_ra>
